<compile_context>
chip_gen: v7x
topology: tpu7x:2x2x1
jax: 0.10.0
libtpu: 0.0.40
codegen_flags: <defaults>
</compile_context>

<pallas_src>
import jax
import jax.numpy as jnp
from jax.experimental import pallas as pl
from jax.experimental.pallas import tpu as pltpu


# ----------------------------------------------------------------------------
# Pallas kernel: o = LeakyReLU( Wa @ A_moving + Wb @ A_fixed + bias )
#   Wa: (Cout, Ca) f32, Wb: (Cout, Cb) f32, bias: (Cout, 1) f32,
#   A_*: (C*, TN) f32 tiles, o: (Cout, TN) f32 tile (lane-dense).
# ----------------------------------------------------------------------------
def _fuse_conv_kernel(wa_ref, wb_ref, bias_ref, a_ref, b_ref, o_ref):
    acc = jnp.dot(wa_ref[...], a_ref[...], preferred_element_type=jnp.float32)
    acc = acc + jnp.dot(wb_ref[...], b_ref[...], preferred_element_type=jnp.float32)
    acc = acc + bias_ref[...]                          # (Cout, 1) f32 broadcast
    o_ref[...] = jnp.where(acc > 0, acc, 0.01 * acc)   # nn.LeakyReLU() slope 0.01


def fuse_conv(x_moving, x_fixed, weight, bias, *, tn=4096):
    """FuseConv.forward:  LeakyReLU(Conv3d_1x1(cat([x_moving, x_fixed], dim=1))).

    x_moving: (B, Ca, D, H, W) f32   (PyTorch NCDHW layout)
    x_fixed : (B, Cb, D, H, W) f32
    weight  : (Cout, Ca+Cb, 1, 1, 1) f32   (PyTorch Conv3d weight layout)
    bias    : (Cout,) f32
    returns : (B, Cout, D, H, W) f32
    """
    B, Ca, D, H, W = x_moving.shape
    Cb = x_fixed.shape[1]
    Cout = weight.shape[0]
    N = D * H * W

    # Free reshapes (no data movement): (B, C, D, H, W) -> (B, C, N).
    a = x_moving.reshape(B, Ca, N)
    b = x_fixed.reshape(B, Cb, N)

    # Tile the spatial axis. If the whole per-batch slab fits one tile, use it
    # directly (block == full dim, no padding, no (8,128) issue). Otherwise use
    # tn (multiple of 128) and pad only in the rare non-divisible case.
    if N <= tn:
        tn_eff = N
        n_pad = N
    else:
        tn_eff = tn
        n_pad = pl.cdiv(N, tn_eff) * tn_eff
        if n_pad != N:
            a = jnp.pad(a, ((0, 0), (0, 0), (0, n_pad - N)))
            b = jnp.pad(b, ((0, 0), (0, 0), (0, n_pad - N)))

    w2 = weight.reshape(Cout, Ca + Cb).astype(jnp.float32)
    wa = w2[:, :Ca]                       # split-K: concat never materialized
    wb = w2[:, Ca:]
    bias2 = bias.reshape(Cout, 1).astype(jnp.float32)

    out = pl.pallas_call(
        _fuse_conv_kernel,
        out_shape=jax.ShapeDtypeStruct((B, Cout, n_pad), jnp.float32),
        grid=(B, n_pad // tn_eff),
        in_specs=[
            pl.BlockSpec((Cout, Ca), lambda bi, i: (0, 0)),       # Wa (resident)
            pl.BlockSpec((Cout, Cb), lambda bi, i: (0, 0)),       # Wb (resident)
            pl.BlockSpec((Cout, 1), lambda bi, i: (0, 0)),        # bias (resident)
            pl.BlockSpec((None, Ca, tn_eff), lambda bi, i: (bi, 0, i)),  # x_moving tile
            pl.BlockSpec((None, Cb, tn_eff), lambda bi, i: (bi, 0, i)),  # x_fixed tile
        ],
        out_specs=pl.BlockSpec((None, Cout, tn_eff), lambda bi, i: (bi, 0, i)),
        compiler_params=pltpu.CompilerParams(
            dimension_semantics=("parallel", "parallel"),
            vmem_limit_bytes=32 * 1024 * 1024,
        ),
    )(wa, wb, bias2, a, b)

    # Free reshape back to NCDHW; slice is a no-op when N was tile-aligned.
    out = out[:, :, :N].reshape(B, Cout, D, H, W)
    return out


# ----------------------------------------------------------------------------
if __name__ == "__main__":
    B, C_each, D, H, W = 2, 8, 16, 16, 16       # FuseConv(in_c=16, out_c=8)
    in_c = 2 * C_each
    out_c = 8

    key = jax.random.PRNGKey(0)
    k1, k2, kw, kb = jax.random.split(key, 4)
    x_moving = jax.random.normal(k1, (B, C_each, D, H, W), jnp.float32)
    x_fixed = jax.random.normal(k2, (B, C_each, D, H, W), jnp.float32)
    bound = in_c ** -0.5                         # PyTorch Conv3d default init bound
    weight = jax.random.uniform(kw, (out_c, in_c, 1, 1, 1), jnp.float32, -bound, bound)
    bias = jax.random.uniform(kb, (out_c,), jnp.float32, -bound, bound)

    fwd = jax.jit(fuse_conv)
    out = fwd(x_moving, x_fixed, weight, bias)
    jax.block_until_ready(out)

    # Plain-JAX f32 reference: LeakyReLU(Conv3d_1x1(cat([x_moving, x_fixed], dim=1)))
    cat = jnp.concatenate([x_moving, x_fixed], axis=1)
    ref = jnp.einsum("bcdhw,oc->bodhw", cat, weight.reshape(out_c, in_c))
    ref = ref + bias.reshape(1, out_c, 1, 1, 1)
    ref = jnp.where(ref > 0, ref, 0.01 * ref)

    assert out.shape == (B, out_c, D, H, W), out.shape
    assert bool(jnp.all(jnp.isfinite(out)))
    max_err = float(jnp.max(jnp.abs(out - ref)))
    # f32 operands with f32 accumulation vs. pure-f32 reference.
    assert max_err < 1e-3, max_err
    print("KERNEL_OK")
</pallas_src>

<mosaic_0001>
module attributes {stable_mosaic.version = 11 : i64} {
  func.func @_fuse_conv_kernel(%arg0: i32, %arg1: i32, %arg2: memref<8x8xf32, #tpu.memory_space<vmem>>, %arg3: memref<8x8xf32, #tpu.memory_space<vmem>>, %arg4: memref<8x1xf32, #tpu.memory_space<vmem>>, %arg5: memref<1x8x4096xf32, #tpu.memory_space<vmem>>, %arg6: memref<1x8x4096xf32, #tpu.memory_space<vmem>>, %arg7: memref<1x8x4096xf32, #tpu.memory_space<vmem>>) attributes {dimension_semantics = [#tpu.dimension_semantics<parallel>, #tpu.dimension_semantics<parallel>], iteration_bounds = array<i64: 2, 1>, scalar_prefetch = 0 : i64, scratch_operands = 0 : i64, tpu.core_type = #tpu.core_type<tc>, window_params = [{pipeline_mode = #tpu.pipeline_mode<synchronous>, transform_indices = @transform_0, window_bounds = array<i64: 8, 8>}, {pipeline_mode = #tpu.pipeline_mode<synchronous>, transform_indices = @transform_1, window_bounds = array<i64: 8, 8>}, {pipeline_mode = #tpu.pipeline_mode<synchronous>, transform_indices = @transform_2, window_bounds = array<i64: 8, 1>}, {transform_indices = @transform_3, window_bounds = array<i64: 1, 8, 4096>}, {transform_indices = @transform_4, window_bounds = array<i64: 1, 8, 4096>}, {transform_indices = @transform_5, window_bounds = array<i64: 1, 8, 4096>}]} {
    %c0 = arith.constant 0 : index
    %c0_0 = arith.constant 0 : index
    %0 = vector.load %arg2[%c0, %c0_0] : memref<8x8xf32, #tpu.memory_space<vmem>>, vector<8x8xf32>
    %c0_1 = arith.constant 0 : index
    %c0_2 = arith.constant 0 : index
    %c0_3 = arith.constant 0 : index
    %1 = vector.load %arg5[%c0_1, %c0_2, %c0_3] : memref<1x8x4096xf32, #tpu.memory_space<vmem>>, vector<1x8x4096xf32>
    %2 = vector.shape_cast %1 : vector<1x8x4096xf32> to vector<8x4096xf32>
    %cst = arith.constant dense<0.000000e+00> : vector<8x4096xf32>
    %3 = tpu.matmul %0, %2, %cst {dimension_numbers = #tpu.dot_dimension_numbers<[1], [0], [0], [1], [0, 0, 1, 1], [], []>} : vector<8x8xf32>, vector<8x4096xf32>, vector<8x4096xf32> -> vector<8x4096xf32>
    %c0_4 = arith.constant 0 : index
    %c0_5 = arith.constant 0 : index
    %4 = vector.load %arg3[%c0_4, %c0_5] : memref<8x8xf32, #tpu.memory_space<vmem>>, vector<8x8xf32>
    %c0_6 = arith.constant 0 : index
    %c0_7 = arith.constant 0 : index
    %c0_8 = arith.constant 0 : index
    %5 = vector.load %arg6[%c0_6, %c0_7, %c0_8] : memref<1x8x4096xf32, #tpu.memory_space<vmem>>, vector<1x8x4096xf32>
    %6 = vector.shape_cast %5 : vector<1x8x4096xf32> to vector<8x4096xf32>
    %cst_9 = arith.constant dense<0.000000e+00> : vector<8x4096xf32>
    %7 = tpu.matmul %4, %6, %cst_9 {dimension_numbers = #tpu.dot_dimension_numbers<[1], [0], [0], [1], [0, 0, 1, 1], [], []>} : vector<8x8xf32>, vector<8x4096xf32>, vector<8x4096xf32> -> vector<8x4096xf32>
    %8 = arith.addf %3, %7 : vector<8x4096xf32>
    %c0_10 = arith.constant 0 : index
    %c0_11 = arith.constant 0 : index
    %9 = vector.load %arg4[%c0_10, %c0_11] : memref<8x1xf32, #tpu.memory_space<vmem>>, vector<8x1xf32>
    %10 = vector.broadcast %9 : vector<8x1xf32> to vector<8x4096xf32>
    %11 = arith.addf %8, %10 : vector<8x4096xf32>
    %cst_12 = arith.constant 0.000000e+00 : f32
    %12 = vector.broadcast %cst_12 : f32 to vector<8x4096xf32>
    %13 = arith.cmpf ogt, %11, %12 : vector<8x4096xf32>
    %cst_13 = arith.constant 0.00999999977 : f32
    %14 = vector.broadcast %cst_13 : f32 to vector<8x4096xf32>
    %15 = arith.mulf %14, %11 : vector<8x4096xf32>
    %16 = arith.select %13, %11, %15 : vector<8x4096xi1>, vector<8x4096xf32>
    %c0_14 = arith.constant 0 : index
    %c0_15 = arith.constant 0 : index
    %c0_16 = arith.constant 0 : index
    %17 = vector.load %arg7[%c0_14, %c0_15, %c0_16] : memref<1x8x4096xf32, #tpu.memory_space<vmem>>, vector<1x8x4096xf32>
    %18 = vector.shape_cast %17 : vector<1x8x4096xf32> to vector<8x4096xf32>
    %19 = vector.shape_cast %16 : vector<8x4096xf32> to vector<1x8x4096xf32>
    tpu.vector_store %arg7[%c0_14, %c0_15, %c0_16], %19 {strides = array<i32>} : memref<1x8x4096xf32, #tpu.memory_space<vmem>>, vector<1x8x4096xf32>,
    return
  }
  func.func @transform_0(%arg0: i32, %arg1: i32) -> (i32, i32) {
    %c0_i32 = arith.constant 0 : i32
    %c0_i32_0 = arith.constant 0 : i32
    %c0_i32_1 = arith.constant 0 : i32
    return %c0_i32, %c0_i32_0 : i32, i32
  }
  func.func @transform_1(%arg0: i32, %arg1: i32) -> (i32, i32) {
    %c0_i32 = arith.constant 0 : i32
    %c0_i32_0 = arith.constant 0 : i32
    %c0_i32_1 = arith.constant 0 : i32
    return %c0_i32, %c0_i32_0 : i32, i32
  }
  func.func @transform_2(%arg0: i32, %arg1: i32) -> (i32, i32) {
    %c0_i32 = arith.constant 0 : i32
    %c0_i32_0 = arith.constant 0 : i32
    %c0_i32_1 = arith.constant 0 : i32
    return %c0_i32, %c0_i32_0 : i32, i32
  }
  func.func @transform_3(%arg0: i32, %arg1: i32) -> (i32, i32, i32) {
    %c0_i32 = arith.constant 0 : i32
    %c0_i32_0 = arith.constant 0 : i32
    return %arg0, %c0_i32, %arg1 : i32, i32, i32
  }
  func.func @transform_4(%arg0: i32, %arg1: i32) -> (i32, i32, i32) {
    %c0_i32 = arith.constant 0 : i32
    %c0_i32_0 = arith.constant 0 : i32
    return %arg0, %c0_i32, %arg1 : i32, i32, i32
  }
  func.func @transform_5(%arg0: i32, %arg1: i32) -> (i32, i32, i32) {
    %c0_i32 = arith.constant 0 : i32
    %c0_i32_0 = arith.constant 0 : i32
    return %arg0, %c0_i32, %arg1 : i32, i32, i32
  }
}

</mosaic_0001>

<bundles_post_ra>
// kernel: fuse_conv.1
= control target key start
LH: loop header
LB: loop body
LE: loop exit
PB: predicated region body
PF: predicated region fallthrough
CT: control target
= control target key end

     0   :  { %s3079_s18 = smov 0   ;;  %s3081_s19 = smov 0   ;;  %s3365_s0 = inlined_call_operand.vmem [shape: f32[8,8], index: 0, kind: input, shape index: {}]   ;;  %s3366_s1 = inlined_call_operand.vmem [shape: f32[8,8], index: 1, kind: input, shape index: {}]   ;;  %s3367_s2 = inlined_call_operand.vmem [shape: f32[8,1], index: 2, kind: input, shape index: {}]   ;;  %s3368_s3 = inlined_call_operand.vmem [shape: f32[2,8,4096], index: 3, kind: input, shape index: {}]   ;;  %s3369_s4 = inlined_call_operand.vmem [shape: f32[2,8,4096], index: 4, kind: input, shape index: {}]   ;;  %s3370_s5 = inlined_call_operand.vmem [shape: f32[2,8,4096], index: 5, kind: output, shape index: {}]  }
   0x1   :  { %s3083_s20 = smov 0  }
   0x2 LB: > { %s27_s21 = sadd.s32 1, %s3041_s19  ;;  %p2920_p0 = scmp.ge.s32.totalorder %s3045_s20, 1  ;;  %s3045_s20 = sphi %s3083_s20, %s15_s20   ;;  %s3041_s19 = sphi %s3081_s19, %s3372_s19   ;;  %s3037_s18 = sphi %s3079_s18, %s3371_s18  }
   0x3   : > { %p29_p1 = scmp.ge.s32.totalorder %s27_s21, 2  ;;  %p225_p2 = scmp.lt.s32.totalorder %s3045_s20, 3 }
   0x5   : > { %s3374_s21 = smov (%p29_p1, %s27_s21), 0  ;;  %p226_p3 = pnand %p2920_p0, %p225_p2 }
   0x6   : > { %p271_p4 = scmp.lt.s32.totalorder (!%p226_p3), %s3037_s18, 1  ;;  %v3047_v0 = vmov (!%p226_p3), 0.0   ;;  %v2645_v1 = vld [vmem:[%s3367_s2] sm:$0xff] (!%p226_p3)  ;;  %v3048_v2 = vmov (!%p226_p3), 0   ;;  %vm366_vm0 = vcmask (!%p226_p3), 64512  }
   0x7   : > { %229 = sbr.rel (%p226_p3) target bundleno = 302 (0x12e), region = 40  ;;  %434 = vmatprep.mubr.f32.mxu0 (!%p226_p3), %v3047_v0  ;;  %505 = vmatprep.mubr.f32.mxu1 (!%p226_p3), %v3047_v0  ;;  %v3113_v3 = vld [vmem:[%s3366_s1] sm:$0xff] (!%p226_p3) }
   0x8   : > { %3022 = vset.pattern.permute.xlu0 (!%p226_p3), %v3048_v2  ;;  %v3206_v40 = vld [vmem:[%s3365_s0] sm:$0xff] (!%p226_p3) }
   0x9   : > { %2648 = vperm.xlu0 (!%p226_p3), %3022, %v2645_v1  }
   0xe   : > { %s3376_s18 = smov (!%p271_p4, %s3037_s18), 1 }
   0xf   : > { %s3102_s24 = sshll.u32 %s3376_s18, 8 }
  0x10   : > { %s3108_s27 = scalar_lea.vmem %s3369_s4, %s3102_s24  ;;  %s3187_s7 = scalar_lea.vmem %s3368_s3, %s3102_s24 }
  0x11   : > { %v335_v4 = vld [vmem:[%s3108_s27 + $0x8] sm:$0xff]  ;;  %v337_v5 = vld [vmem:[%s3108_s27 + $0x18] sm:$0xff]  ;;  %v334_v6 = vld [vmem:[%s3108_s27] sm:$0xff]  ;;  %s3294_s12 = scalar_lea.vmem %s3370_s5, %s3102_s24 }
  0x12   : > { %370 = vmatprep.subr.mxu0 %v335_v4  ;;  %441 = vmatprep.subr.mxu1 %v337_v5  ;;  %v336_v7 = vld [vmem:[%s3108_s27 + $0x10] sm:$0xff]  ;;  %v339_v8 = vld [vmem:[%s3108_s27 + $0x28] sm:$0xff]  ;;  %v341_v9 = vld [vmem:[%s3108_s27 + $0x38] sm:$0xff] }
  0x13   : > { %371 = vmatpush1.msra.mxu0 %v334_v6  ;;  %442 = vmatpush1.msra.mxu1 %v336_v7  ;;  %v338_v10 = vld [vmem:[%s3108_s27 + $0x20] sm:$0xff]  ;;  %v340_v11 = vld [vmem:[%s3108_s27 + $0x30] sm:$0xff]  ;;  %v343_v12 = vld [vmem:[%s3108_s27 + $0x48] sm:$0xff] }
  0x14   : > { %2927 = vmatmul.mubr.msk.f32.vlgmr.msra.gmra.mrb[0].mxu0 %vm366_vm0, %v3113_v3  ;;  %2928 = vmatmul.mubr.msk.f32.vlgmr.msra.gmra.mrb[0].mxu1 %vm366_vm0, %v3113_v3  ;;  %v345_v13 = vld [vmem:[%s3108_s27 + $0x58] sm:$0xff]  ;;  %v342_v14 = vld [vmem:[%s3108_s27 + $0x40] sm:$0xff]  ;;  %v344_v15 = vld [vmem:[%s3108_s27 + $0x50] sm:$0xff] }
  0x15   : > { %512 = vmatprep.subr.mxu0 %v339_v8  ;;  %583 = vmatprep.subr.mxu1 %v341_v9  ;;  %v347_v16 = vld [vmem:[%s3108_s27 + $0x68] sm:$0xff]  ;;  %v349_v17 = vld [vmem:[%s3108_s27 + $0x78] sm:$0xff]  ;;  %v346_v18 = vld [vmem:[%s3108_s27 + $0x60] sm:$0xff] }
  0x16   : > { %513 = vmatpush1.msra.mxu0 %v338_v10  ;;  %584 = vmatpush1.msra.mxu1 %v340_v11  ;;  %v348_v19 = vld [vmem:[%s3108_s27 + $0x70] sm:$0xff]  ;;  %v351_v20 = vld [vmem:[%s3108_s27 + $0x88] sm:$0xff]  ;;  %v353_v21 = vld [vmem:[%s3108_s27 + $0x98] sm:$0xff] }
  0x17   : > { %576 = vmatprep.mubr.f32.mxu0 %v3047_v0  ;;  %647 = vmatprep.mubr.f32.mxu1 %v3047_v0  ;;  %v350_v22 = vld [vmem:[%s3108_s27 + $0x80] sm:$0xff]  ;;  %v352_v23 = vld [vmem:[%s3108_s27 + $0x90] sm:$0xff]  ;;  %v355_v24 = vld [vmem:[%s3108_s27 + $0xa8] sm:$0xff] }
  0x18   : > { %2929 = vmatmul.mubr.msk.f32.vlgmr.msra.gmra.mrb[2].mxu0 %vm366_vm0, %v3113_v3  ;;  %2930 = vmatmul.mubr.msk.f32.vlgmr.msra.gmra.mrb[2].mxu1 %vm366_vm0, %v3113_v3  ;;  %v357_v25 = vld [vmem:[%s3108_s27 + $0xb8] sm:$0xff]  ;;  %v354_v26 = vld [vmem:[%s3108_s27 + $0xa0] sm:$0xff]  ;;  %v356_v27 = vld [vmem:[%s3108_s27 + $0xb0] sm:$0xff] }
  0x19   : > { %654 = vmatprep.subr.mxu0 %v343_v12  ;;  %725 = vmatprep.subr.mxu1 %v345_v13  ;;  %v359_v28 = vld [vmem:[%s3108_s27 + $0xc8] sm:$0xff]  ;;  %v361_v29 = vld [vmem:[%s3108_s27 + $0xd8] sm:$0xff]  ;;  %v358_v30 = vld [vmem:[%s3108_s27 + $0xc0] sm:$0xff] }
  0x1a   : > { %655 = vmatpush1.msra.mxu0 %v342_v14  ;;  %726 = vmatpush1.msra.mxu1 %v344_v15  ;;  %v360_v31 = vld [vmem:[%s3108_s27 + $0xd0] sm:$0xff]  ;;  %v363_v32 = vld [vmem:[%s3108_s27 + $0xe8] sm:$0xff]  ;;  %v365_v33 = vld [vmem:[%s3108_s27 + $0xf8] sm:$0xff] }
  0x1b   : > { %718 = vmatprep.mubr.f32.mxu0 %v3047_v0  ;;  %789 = vmatprep.mubr.f32.mxu1 %v3047_v0  ;;  %v362_v34 = vld [vmem:[%s3108_s27 + $0xe0] sm:$0xff]  ;;  %v364_v35 = vld [vmem:[%s3108_s27 + $0xf0] sm:$0xff]  ;;  %v302_v36 = vld [vmem:[%s3187_s7 + $0x8] sm:$0xff] }
  0x1c   : > { %2931 = vmatmul.mubr.msk.f32.vlgmr.msra.gmra.mrb[4].mxu0 %vm366_vm0, %v3113_v3  ;;  %2932 = vmatmul.mubr.msk.f32.vlgmr.msra.gmra.mrb[4].mxu1 %vm366_vm0, %v3113_v3  ;;  %v304_v37 = vld [vmem:[%s3187_s7 + $0x18] sm:$0xff]  ;;  %v301_v38 = vld [vmem:[%s3187_s7] sm:$0xff]  ;;  %v303_v39 = vld [vmem:[%s3187_s7 + $0x10] sm:$0xff] }
  0x1d   : > { %796 = vmatprep.subr.mxu0 %v347_v16  ;;  %867 = vmatprep.subr.mxu1 %v349_v17  ;;  %v306_v41 = vld [vmem:[%s3187_s7 + $0x28] sm:$0xff]  ;;  %v308_v42 = vld [vmem:[%s3187_s7 + $0x38] sm:$0xff]  ;;  %v305_v43 = vld [vmem:[%s3187_s7 + $0x20] sm:$0xff] }
  0x1e   : > { %797 = vmatpush1.msra.mxu0 %v346_v18  ;;  %868 = vmatpush1.msra.mxu1 %v348_v19  ;;  %v307_v44 = vld [vmem:[%s3187_s7 + $0x30] sm:$0xff]  ;;  %v310_v45 = vld [vmem:[%s3187_s7 + $0x48] sm:$0xff]  ;;  %v312_v46 = vld [vmem:[%s3187_s7 + $0x58] sm:$0xff] }
  0x1f   : > { %860 = vmatprep.mubr.f32.mxu0 %v3047_v0  ;;  %931 = vmatprep.mubr.f32.mxu1 %v3047_v0  ;;  %v309_v47 = vld [vmem:[%s3187_s7 + $0x40] sm:$0xff]  ;;  %v311_v48 = vld [vmem:[%s3187_s7 + $0x50] sm:$0xff]  ;;  %v314_v49 = vld [vmem:[%s3187_s7 + $0x68] sm:$0xff] }
  0x20   : > { %2933 = vmatmul.mubr.msk.f32.vlgmr.msra.gmra.mrb[6].mxu0 %vm366_vm0, %v3113_v3  ;;  %2934 = vmatmul.mubr.msk.f32.vlgmr.msra.gmra.mrb[6].mxu1 %vm366_vm0, %v3113_v3  ;;  %v316_v50 = vld [vmem:[%s3187_s7 + $0x78] sm:$0xff]  ;;  %v313_v51 = vld [vmem:[%s3187_s7 + $0x60] sm:$0xff]  ;;  %v315_v52 = vld [vmem:[%s3187_s7 + $0x70] sm:$0xff] }
  0x21   : > { %938 = vmatprep.subr.mxu0 %v351_v20  ;;  %1009 = vmatprep.subr.mxu1 %v353_v21  ;;  %v318_v53 = vld [vmem:[%s3187_s7 + $0x88] sm:$0xff]  ;;  %v320_v54 = vld [vmem:[%s3187_s7 + $0x98] sm:$0xff]  ;;  %v317_v55 = vld [vmem:[%s3187_s7 + $0x80] sm:$0xff] }
  0x22   : > { %939 = vmatpush1.msra.mxu0 %v350_v22  ;;  %1010 = vmatpush1.msra.mxu1 %v352_v23  ;;  %v319_v56 = vld [vmem:[%s3187_s7 + $0x90] sm:$0xff]  ;;  %v322_v57 = vld [vmem:[%s3187_s7 + $0xa8] sm:$0xff]  ;;  %v324_v58 = vld [vmem:[%s3187_s7 + $0xb8] sm:$0xff] }
  0x23   : > { %1002 = vmatprep.mubr.f32.mxu0 %v3047_v0  ;;  %1073 = vmatprep.mubr.f32.mxu1 %v3047_v0  ;;  %v321_v59 = vld [vmem:[%s3187_s7 + $0xa0] sm:$0xff]  ;;  %v323_v60 = vld [vmem:[%s3187_s7 + $0xb0] sm:$0xff]  ;;  %v326_v61 = vld [vmem:[%s3187_s7 + $0xc8] sm:$0xff] }
  0x24   : > { %2935 = vmatmul.mubr.msk.f32.vlgmr.msra.gmra.mrb[8].mxu0 %vm366_vm0, %v3113_v3  ;;  %2936 = vmatmul.mubr.msk.f32.vlgmr.msra.gmra.mrb[8].mxu1 %vm366_vm0, %v3113_v3  ;;  %v328_v62 = vld [vmem:[%s3187_s7 + $0xd8] sm:$0xff]  ;;  %v325_v63 = vld [vmem:[%s3187_s7 + $0xc0] sm:$0xff]  ;;  %v327_v1 = vld [vmem:[%s3187_s7 + $0xd0] sm:$0xff] }
  0x25   : > { %1080 = vmatprep.subr.mxu0 %v355_v24  ;;  %1151 = vmatprep.subr.mxu1 %v357_v25  ;;  %v330_v2 = vld [vmem:[%s3187_s7 + $0xe8] sm:$0xff]  ;;  %v329_v4 = vld [vmem:[%s3187_s7 + $0xe0] sm:$0xff]  ;;  %v331_v5 = vld [vmem:[%s3187_s7 + $0xf0] sm:$0xff] }
  0x26   : > { %1081 = vmatpush1.msra.mxu0 %v354_v26  ;;  %1152 = vmatpush1.msra.mxu1 %v356_v27 }
  0x27   : > { %1144 = vmatprep.mubr.f32.mxu0 %v3047_v0  ;;  %1215 = vmatprep.mubr.f32.mxu1 %v3047_v0 }
  0x28   : > { %2937 = vmatmul.mubr.msk.f32.vlgmr.msra.gmra.mrb[10].mxu0 %vm366_vm0, %v3113_v3  ;;  %2938 = vmatmul.mubr.msk.f32.vlgmr.msra.gmra.mrb[10].mxu1 %vm366_vm0, %v3113_v3 }
  0x29   : > { %1222 = vmatprep.subr.mxu0 %v359_v28  ;;  %1293 = vmatprep.subr.mxu1 %v361_v29 }
  0x2a   : > { %1223 = vmatpush1.msra.mxu0 %v358_v30  ;;  %1294 = vmatpush1.msra.mxu1 %v360_v31 }
  0x2b   : > { %1286 = vmatprep.mubr.f32.mxu0 %v3047_v0  ;;  %1357 = vmatprep.mubr.f32.mxu1 %v3047_v0 }
  0x2c   : > { %2939 = vmatmul.mubr.msk.f32.vlgmr.msra.gmra.mrb[12].mxu0 %vm366_vm0, %v3113_v3  ;;  %2940 = vmatmul.mubr.msk.f32.vlgmr.msra.gmra.mrb[12].mxu1 %vm366_vm0, %v3113_v3 }
  0x2d   : > { %1364 = vmatprep.subr.mxu0 %v363_v32  ;;  %1435 = vmatprep.subr.mxu1 %v365_v33 }
  0x2e   : > { %1365 = vmatpush1.msra.mxu0 %v362_v34  ;;  %1436 = vmatpush1.msra.mxu1 %v364_v35 }
  0x2f   : > { %1428 = vmatprep.mubr.f32.mxu0 %v3047_v0  ;;  %1499 = vmatprep.mubr.f32.mxu1 %v3047_v0 }
  0x30   : > { %2941 = vmatmul.mubr.msk.f32.vlgmr.msra.gmra.mrb[14].mxu0 %vm366_vm0, %v3113_v3  ;;  %2942 = vmatmul.mubr.msk.f32.vlgmr.msra.gmra.mrb[14].mxu1 %vm366_vm0, %v3113_v3  ;;  %v332_v3 = vld [vmem:[%s3187_s7 + $0xf8] sm:$0xff] }
  0x31   : > { %1509 = vmatprep.subr.mxu0 %v302_v36  ;;  %1580 = vmatprep.subr.mxu1 %v304_v37 }
  0x32   : > { %1510 = vmatpush1.msra.mxu0 %v301_v38  ;;  %1581 = vmatpush1.msra.mxu1 %v303_v39 }
  0x33   : > { %1573 = vmatprep.mubr.f32.mxu0 %v3047_v0  ;;  %1644 = vmatprep.mubr.f32.mxu1 %v3047_v0 }
  0x34   : > { %2943 = vmatmul.mubr.msk.f32.vlgmr.msra.gmra.mrb[0].mxu0 %vm366_vm0, %v3206_v40  ;;  %2944 = vmatmul.mubr.msk.f32.vlgmr.msra.gmra.mrb[0].mxu1 %vm366_vm0, %v3206_v40 }
  0x35   : > { %1651 = vmatprep.subr.mxu0 %v306_v41  ;;  %1722 = vmatprep.subr.mxu1 %v308_v42 }
  0x36   : > { %1652 = vmatpush1.msra.mxu0 %v305_v43  ;;  %1723 = vmatpush1.msra.mxu1 %v307_v44 }
  0x37   : > { %1715 = vmatprep.mubr.f32.mxu0 %v3047_v0  ;;  %1786 = vmatprep.mubr.f32.mxu1 %v3047_v0 }
  0x38   : > { %2945 = vmatmul.mubr.msk.f32.vlgmr.msra.gmra.mrb[2].mxu0 %vm366_vm0, %v3206_v40  ;;  %2946 = vmatmul.mubr.msk.f32.vlgmr.msra.gmra.mrb[2].mxu1 %vm366_vm0, %v3206_v40 }
  0x39   : > { %1793 = vmatprep.subr.mxu0 %v310_v45  ;;  %1864 = vmatprep.subr.mxu1 %v312_v46 }
  0x3a   : > { %1794 = vmatpush1.msra.mxu0 %v309_v47  ;;  %1865 = vmatpush1.msra.mxu1 %v311_v48 }
  0x3b   : > { %1857 = vmatprep.mubr.f32.mxu0 %v3047_v0  ;;  %1928 = vmatprep.mubr.f32.mxu1 %v3047_v0 }
  0x3c   : > { %2947 = vmatmul.mubr.msk.f32.vlgmr.msra.gmra.mrb[4].mxu0 %vm366_vm0, %v3206_v40  ;;  %2948 = vmatmul.mubr.msk.f32.vlgmr.msra.gmra.mrb[4].mxu1 %vm366_vm0, %v3206_v40 }
  0x3d   : > { %1935 = vmatprep.subr.mxu0 %v314_v49  ;;  %2006 = vmatprep.subr.mxu1 %v316_v50 }
  0x3e   : > { %1936 = vmatpush1.msra.mxu0 %v313_v51  ;;  %2007 = vmatpush1.msra.mxu1 %v315_v52 }
  0x3f   : > { %1999 = vmatprep.mubr.f32.mxu0 %v3047_v0  ;;  %2070 = vmatprep.mubr.f32.mxu1 %v3047_v0 }
  0x40   : > { %2949 = vmatmul.mubr.msk.f32.vlgmr.msra.gmra.mrb[6].mxu0 %vm366_vm0, %v3206_v40  ;;  %2950 = vmatmul.mubr.msk.f32.vlgmr.msra.gmra.mrb[6].mxu1 %vm366_vm0, %v3206_v40 }
  0x41   : > { %2077 = vmatprep.subr.mxu0 %v318_v53  ;;  %2148 = vmatprep.subr.mxu1 %v320_v54 }
  0x42   : > { %2078 = vmatpush1.msra.mxu0 %v317_v55  ;;  %2149 = vmatpush1.msra.mxu1 %v319_v56 }
  0x43   : > { %2141 = vmatprep.mubr.f32.mxu0 %v3047_v0  ;;  %2212 = vmatprep.mubr.f32.mxu1 %v3047_v0 }
  0x44   : > { %2951 = vmatmul.mubr.msk.f32.vlgmr.msra.gmra.mrb[8].mxu0 %vm366_vm0, %v3206_v40  ;;  %2952 = vmatmul.mubr.msk.f32.vlgmr.msra.gmra.mrb[8].mxu1 %vm366_vm0, %v3206_v40 }
  0x45   : > { %2219 = vmatprep.subr.mxu0 %v322_v57  ;;  %2290 = vmatprep.subr.mxu1 %v324_v58 }
  0x46   : > { %2220 = vmatpush1.msra.mxu0 %v321_v59  ;;  %2291 = vmatpush1.msra.mxu1 %v323_v60 }
  0x47   : > { %2283 = vmatprep.mubr.f32.mxu0 %v3047_v0  ;;  %2354 = vmatprep.mubr.f32.mxu1 %v3047_v0 }
  0x48   : > { %2953 = vmatmul.mubr.msk.f32.vlgmr.msra.gmra.mrb[10].mxu0 %vm366_vm0, %v3206_v40  ;;  %2954 = vmatmul.mubr.msk.f32.vlgmr.msra.gmra.mrb[10].mxu1 %vm366_vm0, %v3206_v40 }
  0x49   : > { %2361 = vmatprep.subr.mxu0 %v326_v61  ;;  %2432 = vmatprep.subr.mxu1 %v328_v62 }
  0x4a   : > { %2362 = vmatpush1.msra.mxu0 %v325_v63  ;;  %2433 = vmatpush1.msra.mxu1 %v327_v1 }
  0x4b   : > { %2425 = vmatprep.mubr.f32.mxu0 %v3047_v0  ;;  %2496 = vmatprep.mubr.f32.mxu1 %v3047_v0 }
  0x4c   : > { %2955 = vmatmul.mubr.msk.f32.vlgmr.msra.gmra.mrb[12].mxu0 %vm366_vm0, %v3206_v40  ;;  %2956 = vmatmul.mubr.msk.f32.vlgmr.msra.gmra.mrb[12].mxu1 %vm366_vm0, %v3206_v40 }
  0x4d   : > { %2503 = vmatprep.subr.mxu0 %v330_v2  ;;  %2574 = vmatprep.subr.mxu1 %v332_v3 }
  0x4e   : > { %2504 = vmatpush1.msra.mxu0 %v329_v4  ;;  %2575 = vmatpush1.msra.mxu1 %v331_v5 }
  0x4f   : > { %2567 = vmatprep.mubr.f32.mxu0 %v3047_v0  ;;  %2638 = vmatprep.mubr.f32.mxu1 %v3047_v0 }
  0x50   : > { %2957 = vmatmul.mubr.msk.f32.vlgmr.msra.gmra.mrb[14].mxu0 %vm366_vm0, %v3206_v40  ;;  %2958 = vmatmul.mubr.msk.f32.vlgmr.msra.gmra.mrb[14].mxu1 %vm366_vm0, %v3206_v40 }
  0x88   : > { %v3284_v6 = vpop.permute.xlu0 %2648 }
 0x107   : > { %v1575_v7 = vpop.f32.mrb[0].mxu0  ;;  %v1646_v8 = vpop.f32.mrb[0].mxu1 }
 0x108   : > { %v2651_v9 = vadd.f32 %v3284_v6, %v1575_v7  ;;  %v2653_v10 = vadd.f32 %v3284_v6, %v1646_v8  ;;  %v1577_v11 = vpop.f32.mrb[1].mxu0  ;;  %v1648_v12 = vpop.f32.mrb[1].mxu1 }
 0x109   : > { %v2652_v13 = vadd.f32 %v3284_v6, %v1577_v11  ;;  %v2654_v0 = vadd.f32 %v3284_v6, %v1648_v12 }
 0x10a   : > { %vm2683_vm1 = vcmp.gt.f32.partialorder %v2651_v9, 0.0  ;;  %v2715_v14 = vmul.f32 0.01, %v2651_v9  ;;  %vm2685_vm2 = vcmp.gt.f32.partialorder %v2653_v10, 0.0  ;;  %v2717_v15 = vmul.f32 0.01, %v2653_v10 }
 0x10b   : > { %vm2684_vm3 = vcmp.gt.f32.partialorder %v2652_v13, 0.0  ;;  %v2716_v16 = vmul.f32 0.01, %v2652_v13  ;;  %vm2686_vm4 = vcmp.gt.f32.partialorder %v2654_v0, 0.0  ;;  %v2718_v17 = vmul.f32 0.01, %v2654_v0 }
 0x10c   : > { %v2747_v18 = vsel %vm2683_vm1, %v2651_v9, %v2715_v14  ;;  %v2749_v19 = vsel %vm2685_vm2, %v2653_v10, %v2717_v15  ;;  %v1717_v20 = vpop.f32.mrb[2].mxu0  ;;  %v1788_v21 = vpop.f32.mrb[2].mxu1 }
 0x10d   : > { %2779 = vst [vmem:[%s3294_s12] sm:$0xff] %v2747_v18  ;;  %2781 = vst [vmem:[%s3294_s12 + $0x10] sm:$0xff] %v2749_v19  ;;  %v2748_v22 = vsel %vm2684_vm3, %v2652_v13, %v2716_v16  ;;  %v2750_v23 = vsel %vm2686_vm4, %v2654_v0, %v2718_v17  ;;  %v2655_v24 = vadd.f32 %v3284_v6, %v1717_v20  ;;  %v1719_v26 = vpop.f32.mrb[3].mxu0  ;;  %v1790_v27 = vpop.f32.mrb[3].mxu1 }
 0x10e   : > { %v2657_v25 = vadd.f32 %v3284_v6, %v1788_v21  ;;  %2780 = vst [vmem:[%s3294_s12 + $0x8] sm:$0xff] %v2748_v22  ;;  %2782 = vst [vmem:[%s3294_s12 + $0x18] sm:$0xff] %v2750_v23  ;;  %v2656_v28 = vadd.f32 %v3284_v6, %v1719_v26  ;;  %v2658_v29 = vadd.f32 %v3284_v6, %v1790_v27 }
 0x10f   : > { %vm2687_vm5 = vcmp.gt.f32.partialorder %v2655_v24, 0.0  ;;  %v2719_v30 = vmul.f32 0.01, %v2655_v24  ;;  %v1859_v36 = vpop.f32.mrb[4].mxu0  ;;  %v1930_v37 = vpop.f32.mrb[4].mxu1 }
 0x110   : > { %vm2689_vm6 = vcmp.gt.f32.partialorder %v2657_v25, 0.0  ;;  %v2721_v31 = vmul.f32 0.01, %v2657_v25  ;;  %vm2688_vm7 = vcmp.gt.f32.partialorder %v2656_v28, 0.0  ;;  %v2720_v32 = vmul.f32 0.01, %v2656_v28 }
 0x111   : > { %vm2690_vm8 = vcmp.gt.f32.partialorder %v2658_v29, 0.0  ;;  %v2722_v33 = vmul.f32 0.01, %v2658_v29  ;;  %v2751_v34 = vsel %vm2687_vm5, %v2655_v24, %v2719_v30  ;;  %v2659_v40 = vadd.f32 %v3284_v6, %v1859_v36  ;;  %v1861_v42 = vpop.f32.mrb[5].mxu0  ;;  %v1932_v43 = vpop.f32.mrb[5].mxu1 }
 0x112   : > { %v2753_v35 = vsel %vm2689_vm6, %v2657_v25, %v2721_v31  ;;  %2783 = vst [vmem:[%s3294_s12 + $0x20] sm:$0xff] %v2751_v34  ;;  %v2752_v38 = vsel %vm2688_vm7, %v2656_v28, %v2720_v32  ;;  %v2661_v41 = vadd.f32 %v3284_v6, %v1930_v37  ;;  %v2660_v44 = vadd.f32 %v3284_v6, %v1861_v42 }
 0x113   : > { %2785 = vst [vmem:[%s3294_s12 + $0x30] sm:$0xff] %v2753_v35  ;;  %v2754_v39 = vsel %vm2690_vm8, %v2658_v29, %v2722_v33  ;;  %2784 = vst [vmem:[%s3294_s12 + $0x28] sm:$0xff] %v2752_v38  ;;  %v2662_v45 = vadd.f32 %v3284_v6, %v1932_v43  ;;  %v2001_v46 = vpop.f32.mrb[6].mxu0  ;;  %v2072_v47 = vpop.f32.mrb[6].mxu1  ;;  %vm2691_vm9 = vcmp.gt.f32.partialorder %v2659_v40, 0.0 }
 0x114   : > { %2786 = vst [vmem:[%s3294_s12 + $0x38] sm:$0xff] %v2754_v39  ;;  %v2723_v48 = vmul.f32 0.01, %v2659_v40  ;;  %vm2693_vm10 = vcmp.gt.f32.partialorder %v2661_v41, 0.0  ;;  %v2725_v49 = vmul.f32 0.01, %v2661_v41  ;;  %v2663_v54 = vadd.f32 %v3284_v6, %v2001_v46 }
 0x115   : > { %vm2692_vm11 = vcmp.gt.f32.partialorder %v2660_v44, 0.0  ;;  %v2724_v50 = vmul.f32 0.01, %v2660_v44  ;;  %vm2694_vm12 = vcmp.gt.f32.partialorder %v2662_v45, 0.0  ;;  %v2726_v51 = vmul.f32 0.01, %v2662_v45 }
 0x116   : > { %v2755_v52 = vsel %vm2691_vm9, %v2659_v40, %v2723_v48  ;;  %v2757_v53 = vsel %vm2693_vm10, %v2661_v41, %v2725_v49  ;;  %v2665_v55 = vadd.f32 %v3284_v6, %v2072_v47  ;;  %v2003_v56 = vpop.f32.mrb[7].mxu0  ;;  %v2074_v57 = vpop.f32.mrb[7].mxu1  ;;  %vm2695_vm13 = vcmp.gt.f32.partialorder %v2663_v54, 0.0 }
 0x117   : > { %2787 = vst [vmem:[%s3294_s12 + $0x40] sm:$0xff] %v2755_v52  ;;  %2789 = vst [vmem:[%s3294_s12 + $0x50] sm:$0xff] %v2757_v53  ;;  %v2756_v58 = vsel %vm2692_vm11, %v2660_v44, %v2724_v50  ;;  %v2758_v59 = vsel %vm2694_vm12, %v2662_v45, %v2726_v51  ;;  %v2664_v60 = vadd.f32 %v3284_v6, %v2003_v56  ;;  %v2143_v62 = vpop.f32.mrb[8].mxu0  ;;  %v2214_v63 = vpop.f32.mrb[8].mxu1  ;;  %v2727_v1 = vmul.f32 0.01, %v2663_v54 }
 0x118   : > { %v2666_v61 = vadd.f32 %v3284_v6, %v2074_v57  ;;  %2788 = vst [vmem:[%s3294_s12 + $0x48] sm:$0xff] %v2756_v58  ;;  %2790 = vst [vmem:[%s3294_s12 + $0x58] sm:$0xff] %v2758_v59  ;;  %vm2697_vm14 = vcmp.gt.f32.partialorder %v2665_v55, 0.0  ;;  %v2729_v2 = vmul.f32 0.01, %v2665_v55  ;;  %v2667_v8 = vadd.f32 %v3284_v6, %v2143_v62  ;;  %v2145_v10 = vpop.f32.mrb[9].mxu0 }
 0x119   : > { %vm2696_vm15 = vcmp.gt.f32.partialorder %v2664_v60, 0.0  ;;  %v2728_v3 = vmul.f32 0.01, %v2664_v60  ;;  %v2759_v5 = vsel %vm2695_vm13, %v2663_v54, %v2727_v1  ;;  %v2669_v9 = vadd.f32 %v3284_v6, %v2214_v63  ;;  %v2216_v11 = vpop.f32.mrb[9].mxu1 }
 0x11a   : > { %vm2698_vm0 = vcmp.gt.f32.partialorder %v2666_v61, 0.0  ;;  %v2730_v4 = vmul.f32 0.01, %v2666_v61  ;;  %v2761_v7 = vsel %vm2697_vm14, %v2665_v55, %v2729_v2  ;;  %2791 = vst [vmem:[%s3294_s12 + $0x60] sm:$0xff] %v2759_v5  ;;  %v2668_v0 = vadd.f32 %v3284_v6, %v2145_v10 }
 0x11b   : > { %2793 = vst [vmem:[%s3294_s12 + $0x70] sm:$0xff] %v2761_v7  ;;  %v2760_v12 = vsel %vm2696_vm15, %v2664_v60, %v2728_v3  ;;  %v2670_v14 = vadd.f32 %v3284_v6, %v2216_v11  ;;  %v2285_v15 = vpop.f32.mrb[10].mxu0  ;;  %v2356_v16 = vpop.f32.mrb[10].mxu1  ;;  %vm2699_vm1 = vcmp.gt.f32.partialorder %v2667_v8, 0.0  ;;  %v2731_v17 = vmul.f32 0.01, %v2667_v8 }
 0x11c   : > { %v2762_v13 = vsel %vm2698_vm0, %v2666_v61, %v2730_v4  ;;  %2792 = vst [vmem:[%s3294_s12 + $0x68] sm:$0xff] %v2760_v12  ;;  %vm2701_vm2 = vcmp.gt.f32.partialorder %v2669_v9, 0.0  ;;  %v2733_v18 = vmul.f32 0.01, %v2669_v9  ;;  %vm2700_vm3 = vcmp.gt.f32.partialorder %v2668_v0, 0.0  ;;  %v2287_v25 = vpop.f32.mrb[11].mxu0 }
 0x11d   : > { %2794 = vst [vmem:[%s3294_s12 + $0x78] sm:$0xff] %v2762_v13  ;;  %v2732_v19 = vmul.f32 0.01, %v2668_v0  ;;  %vm2702_vm4 = vcmp.gt.f32.partialorder %v2670_v14, 0.0  ;;  %v2734_v20 = vmul.f32 0.01, %v2670_v14  ;;  %v2763_v21 = vsel %vm2699_vm1, %v2667_v8, %v2731_v17 }
 0x11e   : > { %v2765_v22 = vsel %vm2701_vm2, %v2669_v9, %v2733_v18  ;;  %v2671_v23 = vadd.f32 %v3284_v6, %v2285_v15  ;;  %v2673_v24 = vadd.f32 %v3284_v6, %v2356_v16  ;;  %v2358_v26 = vpop.f32.mrb[11].mxu1  ;;  %2795 = vst [vmem:[%s3294_s12 + $0x80] sm:$0xff] %v2763_v21  ;;  %v2672_v29 = vadd.f32 %v3284_v6, %v2287_v25 }
 0x11f   : > { %2797 = vst [vmem:[%s3294_s12 + $0x90] sm:$0xff] %v2765_v22  ;;  %v2764_v27 = vsel %vm2700_vm3, %v2668_v0, %v2732_v19  ;;  %v2766_v28 = vsel %vm2702_vm4, %v2670_v14, %v2734_v20  ;;  %v2674_v30 = vadd.f32 %v3284_v6, %v2358_v26  ;;  %v2427_v31 = vpop.f32.mrb[12].mxu0  ;;  %v2498_v32 = vpop.f32.mrb[12].mxu1 }
 0x120   : > { %2796 = vst [vmem:[%s3294_s12 + $0x88] sm:$0xff] %v2764_v27  ;;  %2798 = vst [vmem:[%s3294_s12 + $0x98] sm:$0xff] %v2766_v28  ;;  %vm2703_vm5 = vcmp.gt.f32.partialorder %v2671_v23, 0.0  ;;  %v2735_v33 = vmul.f32 0.01, %v2671_v23  ;;  %vm2705_vm6 = vcmp.gt.f32.partialorder %v2673_v24, 0.0  ;;  %v2675_v39 = vadd.f32 %v3284_v6, %v2427_v31 }
 0x121   : > { %v2737_v34 = vmul.f32 0.01, %v2673_v24  ;;  %vm2704_vm7 = vcmp.gt.f32.partialorder %v2672_v29, 0.0  ;;  %v2736_v35 = vmul.f32 0.01, %v2672_v29  ;;  %vm2706_vm8 = vcmp.gt.f32.partialorder %v2674_v30, 0.0 }
 0x122   : > { %v2738_v36 = vmul.f32 0.01, %v2674_v30  ;;  %v2767_v37 = vsel %vm2703_vm5, %v2671_v23, %v2735_v33  ;;  %v2677_v40 = vadd.f32 %v3284_v6, %v2498_v32  ;;  %v2429_v41 = vpop.f32.mrb[13].mxu0  ;;  %v2500_v42 = vpop.f32.mrb[13].mxu1  ;;  %vm2707_vm9 = vcmp.gt.f32.partialorder %v2675_v39, 0.0 }
 0x123   : > { %v2769_v38 = vsel %vm2705_vm6, %v2673_v24, %v2737_v34  ;;  %2799 = vst [vmem:[%s3294_s12 + $0xa0] sm:$0xff] %v2767_v37  ;;  %v2768_v43 = vsel %vm2704_vm7, %v2672_v29, %v2736_v35  ;;  %v2676_v45 = vadd.f32 %v3284_v6, %v2429_v41  ;;  %v2678_v46 = vadd.f32 %v3284_v6, %v2500_v42  ;;  %v2569_v47 = vpop.f32.mrb[14].mxu0  ;;  %v2640_v48 = vpop.f32.mrb[14].mxu1 }
 0x124   : > { %2801 = vst [vmem:[%s3294_s12 + $0xb0] sm:$0xff] %v2769_v38  ;;  %v2770_v44 = vsel %vm2706_vm8, %v2674_v30, %v2738_v36  ;;  %2800 = vst [vmem:[%s3294_s12 + $0xa8] sm:$0xff] %v2768_v43  ;;  %v2739_v49 = vmul.f32 0.01, %v2675_v39  ;;  %vm2709_vm10 = vcmp.gt.f32.partialorder %v2677_v40, 0.0  ;;  %v2679_v55 = vadd.f32 %v3284_v6, %v2569_v47  ;;  %v2571_v57 = vpop.f32.mrb[15].mxu0 }
 0x125   : > { %2802 = vst [vmem:[%s3294_s12 + $0xb8] sm:$0xff] %v2770_v44  ;;  %v2741_v50 = vmul.f32 0.01, %v2677_v40  ;;  %vm2708_vm11 = vcmp.gt.f32.partialorder %v2676_v45, 0.0  ;;  %v2740_v51 = vmul.f32 0.01, %v2676_v45  ;;  %v2681_v56 = vadd.f32 %v3284_v6, %v2640_v48 }
 0x126   : > { %vm2710_vm12 = vcmp.gt.f32.partialorder %v2678_v46, 0.0  ;;  %v2742_v52 = vmul.f32 0.01, %v2678_v46  ;;  %v2771_v53 = vsel %vm2707_vm9, %v2675_v39, %v2739_v49  ;;  %v2642_v58 = vpop.f32.mrb[15].mxu1  ;;  %v2680_v61 = vadd.f32 %v3284_v6, %v2571_v57 }
 0x127   : > { %v2773_v54 = vsel %vm2709_vm10, %v2677_v40, %v2741_v50  ;;  %2803 = vst [vmem:[%s3294_s12 + $0xc0] sm:$0xff] %v2771_v53  ;;  %v2772_v59 = vsel %vm2708_vm11, %v2676_v45, %v2740_v51  ;;  %v2682_v62 = vadd.f32 %v3284_v6, %v2642_v58  ;;  %vm2711_vm13 = vcmp.gt.f32.partialorder %v2679_v55, 0.0 }
 0x128   : > { %2805 = vst [vmem:[%s3294_s12 + $0xd0] sm:$0xff] %v2773_v54  ;;  %v2774_v60 = vsel %vm2710_vm12, %v2678_v46, %v2742_v52  ;;  %2804 = vst [vmem:[%s3294_s12 + $0xc8] sm:$0xff] %v2772_v59  ;;  %v2743_v63 = vmul.f32 0.01, %v2679_v55  ;;  %vm2713_vm14 = vcmp.gt.f32.partialorder %v2681_v56, 0.0  ;;  %vm2712_vm15 = vcmp.gt.f32.partialorder %v2680_v61, 0.0 }
 0x129   : > { %2806 = vst [vmem:[%s3294_s12 + $0xd8] sm:$0xff] %v2774_v60  ;;  %v2745_v1 = vmul.f32 0.01, %v2681_v56  ;;  %v2744_v2 = vmul.f32 0.01, %v2680_v61  ;;  %vm2714_vm0 = vcmp.gt.f32.partialorder %v2682_v62, 0.0 }
 0x12a   : > { %v2746_v3 = vmul.f32 0.01, %v2682_v62  ;;  %v2775_v4 = vsel %vm2711_vm13, %v2679_v55, %v2743_v63 }
 0x12b   : > { %v2777_v5 = vsel %vm2713_vm14, %v2681_v56, %v2745_v1  ;;  %2807 = vst [vmem:[%s3294_s12 + $0xe0] sm:$0xff] %v2775_v4  ;;  %v2776_v7 = vsel %vm2712_vm15, %v2680_v61, %v2744_v2 }
 0x12c   : > { %2809 = vst [vmem:[%s3294_s12 + $0xf0] sm:$0xff] %v2777_v5  ;;  %v2778_v8 = vsel %vm2714_vm0, %v2682_v62, %v2746_v3  ;;  %2808 = vst [vmem:[%s3294_s12 + $0xe8] sm:$0xff] %v2776_v7 }
 0x12d   : > { %2810 = vst [vmem:[%s3294_s12 + $0xf8] sm:$0xff] %v2778_v8 }
 0x12e PF: > { %s15_s20 = sadd.s32 1, %s3045_s20   ;;  %s3371_s18 = smov %s3041_s19 }
 0x12f   : > { %p12_p5 = scmp.ge.s32.totalorder %s15_s20, 4   ;;  %s3372_s19 = smov %s3374_s21 }
 0x131   :  { %14 = sbr.rel (!%p12_p5) target bundleno = 2 (0x2), region = 73 }

</bundles_post_ra>
